<compile_context>
chip_gen: v5e
topology: v5e:2x2
jax: 0.10.0
libtpu: 0.0.40
codegen_flags: <defaults>
</compile_context>

<pallas_src>
import functools

import jax
import jax.numpy as jnp
from jax.experimental import pallas as pl
from jax.experimental.pallas import tpu as pltpu


def _silu(v):
    return v * jax.nn.sigmoid(v)


def time_merge_kernel(x_ref, scale_ref, shift_ref,
                      w1_ref, b1_ref, g1_ref,
                      w2_ref, b2_ref, g2_ref,
                      *rest, dim_out, use_res_conv, matmul_dtype):
    if use_res_conv:
        w_res_ref, b_res_ref, o_ref = rest
    else:
        (o_ref,) = rest

    x = x_ref[0]                       # (Cin, TN), f32
    xm = x.astype(matmul_dtype)        # bf16 matmul operand

    rms_scale = dim_out ** 0.5

    def rmsnorm(v, g_ref):
        # channel dim is axis 0 (sublanes); matches F.normalize(x, dim=1)*g*sqrt(C)
        ss = jnp.sum(v * v, axis=0, keepdims=True)            # (1, TN)
        inv = jax.lax.rsqrt(jnp.maximum(ss, 1e-24))           # == 1/max(||v||,1e-12)
        return v * inv * (g_ref[...] * rms_scale)

    scale = scale_ref[0]               # (Cout, 1)
    shift = shift_ref[0]               # (Cout, 1)

    # --- block1: conv1d(1x1) -> RMSNorm -> x*(scale+1)+shift -> SiLU ---
    # (dropout p=0.0 is identity at inference; omitted)
    h = jnp.dot(w1_ref[...], xm, preferred_element_type=jnp.float32) + b1_ref[...]
    h = rmsnorm(h, g1_ref)
    h = h * (scale + 1.0) + shift
    h = _silu(h)

    # --- block2: conv1d(1x1) -> RMSNorm -> SiLU ---
    h = jnp.dot(w2_ref[...], h.astype(matmul_dtype),
                preferred_element_type=jnp.float32) + b2_ref[...]
    h = rmsnorm(h, g2_ref)
    h = _silu(h)

    # --- residual: 1x1 conv if dim_in != dim_out else identity ---
    if use_res_conv:
        r = jnp.dot(w_res_ref[...], xm,
                    preferred_element_type=jnp.float32) + b_res_ref[...]
    else:
        r = x

    o_ref[0] = (h + r).astype(o_ref.dtype)


def time_merge(x, time_emb, params, *, dim_in, dim_out, time_emb_dim,
               matmul_dtype=jnp.bfloat16, tn_cap=2048):
    """x: [bs, dim_in, n_stk, n_stk_pnt] or [bs, dim_in, N] (PyTorch NCHW/NCL).
       time_emb: [bs, time_emb_dim].  Returns the same rank as x with dim_out channels."""
    orig_ndim = x.ndim
    if orig_ndim == 4:
        bs, emb, n_stk, n_stk_pnt = x.shape
        N = n_stk * n_stk_pnt
    else:
        bs, emb, N = x.shape
    assert emb == dim_in
    xc = x.reshape(bs, dim_in, N).astype(jnp.float32)      # free view, no transpose

    # Pad N up to a lane multiple and pick a tile that divides it (TN multiple of 128).
    n_pad = -(-N // 128) * 128
    if n_pad != N:
        xc = jnp.pad(xc, ((0, 0), (0, 0), (0, n_pad - N)))
    tn = min(tn_cap, n_pad)
    while n_pad % tn:
        tn -= 128

    use_res_conv = dim_in != dim_out

    # Time-MLP hoisted out of the kernel (tiny, would otherwise be recomputed per tile).
    # TODO(synk): eu.activate_func() is undefined in the snippet; SiLU assumed.
    te = _silu(time_emb.astype(jnp.float32)) @ params["w_mlp"] + params["b_mlp"]
    scale = te[:, :dim_out].reshape(bs, dim_out, 1)        # chunk(2, dim=1) -> (scale, shift)
    shift = te[:, dim_out:].reshape(bs, dim_out, 1)

    def rep2(shape):
        return pl.BlockSpec(shape, lambda b, n: (0, 0))

    in_specs = [
        pl.BlockSpec((1, dim_in, tn), lambda b, n: (b, 0, n)),     # x tile
        pl.BlockSpec((1, dim_out, 1), lambda b, n: (b, 0, 0)),     # scale
        pl.BlockSpec((1, dim_out, 1), lambda b, n: (b, 0, 0)),     # shift
        rep2((dim_out, dim_in)),                                   # w1
        rep2((dim_out, 1)),                                        # b1
        rep2((dim_out, 1)),                                        # g1
        rep2((dim_out, dim_out)),                                  # w2
        rep2((dim_out, 1)),                                        # b2
        rep2((dim_out, 1)),                                        # g2
    ]
    args = [xc, scale, shift,
            params["w1"].astype(matmul_dtype), params["b1"], params["g1"],
            params["w2"].astype(matmul_dtype), params["b2"], params["g2"]]
    if use_res_conv:
        in_specs += [rep2((dim_out, dim_in)), rep2((dim_out, 1))]
        args += [params["w_res"].astype(matmul_dtype), params["b_res"]]

    kernel = functools.partial(time_merge_kernel, dim_out=dim_out,
                               use_res_conv=use_res_conv, matmul_dtype=matmul_dtype)

    out = pl.pallas_call(
        kernel,
        out_shape=jax.ShapeDtypeStruct((bs, dim_out, n_pad), jnp.float32),
        grid_spec=pltpu.PrefetchScalarGridSpec(
            num_scalar_prefetch=0,
            grid=(bs, n_pad // tn),
            in_specs=in_specs,
            out_specs=pl.BlockSpec((1, dim_out, tn), lambda b, n: (b, 0, n)),
        ),
        compiler_params=pltpu.CompilerParams(
            dimension_semantics=("parallel", "parallel"),
            vmem_limit_bytes=48 * 1024 * 1024),
    )(*args)

    out = out[:, :, :N]
    if orig_ndim == 4:
        out = out.reshape(bs, dim_out, n_stk, n_stk_pnt)
    return out


def make_params(key, dim_in, dim_out, time_emb_dim):
    ks = jax.random.split(key, 8)
    p = {
        # Linear(time_emb_dim, 2*dim_out): stored transposed (in, out) for host matmul
        "w_mlp": jax.random.normal(ks[0], (time_emb_dim, 2 * dim_out), jnp.float32) * 0.1,
        "b_mlp": jax.random.normal(ks[1], (2 * dim_out,), jnp.float32) * 0.1,
        # Conv1d(dim, dim_out, 1): weight (out, in, 1) -> stored (out, in)
        "w1": jax.random.normal(ks[2], (dim_out, dim_in), jnp.float32) * 0.1,
        "b1": jax.random.normal(ks[3], (dim_out, 1), jnp.float32) * 0.1,
        "g1": jnp.ones((dim_out, 1), jnp.float32),      # RMSNorm g (init = ones)
        "w2": jax.random.normal(ks[4], (dim_out, dim_out), jnp.float32) * 0.1,
        "b2": jax.random.normal(ks[5], (dim_out, 1), jnp.float32) * 0.1,
        "g2": jnp.ones((dim_out, 1), jnp.float32),
    }
    if dim_in != dim_out:
        # Conv2d(dim_in, dim_out, 1) residual
        p["w_res"] = jax.random.normal(ks[6], (dim_out, dim_in), jnp.float32) * 0.1
        p["b_res"] = jax.random.normal(ks[7], (dim_out, 1), jnp.float32) * 0.1
    return p


def time_merge_ref(x, time_emb, params, *, dim_in, dim_out, matmul_dtype=jnp.bfloat16):
    """Pure-JAX reference (NCL math, same bf16 matmul-operand casting)."""
    shp = x.shape
    bs = shp[0]
    xc = x.reshape(bs, dim_in, -1).astype(jnp.float32)     # (bs, Cin, N)
    te = _silu(time_emb.astype(jnp.float32)) @ params["w_mlp"] + params["b_mlp"]
    scale = te[:, :dim_out, None]
    shift = te[:, dim_out:, None]
    rms = dim_out ** 0.5

    def mm(w, v):
        return jnp.einsum("oc,bcn->bon", w.astype(matmul_dtype), v.astype(matmul_dtype),
                          preferred_element_type=jnp.float32)

    def norm(v, g):
        ss = jnp.sum(v * v, axis=1, keepdims=True)
        return v * jax.lax.rsqrt(jnp.maximum(ss, 1e-24)) * g * rms

    h = mm(params["w1"], xc) + params["b1"][None]
    h = norm(h, params["g1"][None])
    h = h * (scale + 1.0) + shift
    h = _silu(h)
    h = mm(params["w2"], h) + params["b2"][None]
    h = norm(h, params["g2"][None])
    h = _silu(h)
    if dim_in != dim_out:
        r = mm(params["w_res"], xc) + params["b_res"][None]
    else:
        r = xc
    out = h + r
    return out.reshape((bs, dim_out) + shp[2:])


if __name__ == "__main__":
    key = jax.random.PRNGKey(0)
    kx, kt, kp, kx2, kp2 = jax.random.split(key, 5)

    # Case 1: dim_in != dim_out (res-conv path), 4D input.
    bs, dim_in, dim_out, time_emb_dim = 2, 4, 8, 16
    n_stk, n_stk_pnt = 16, 16
    x = jax.random.normal(kx, (bs, dim_in, n_stk, n_stk_pnt), jnp.float32)
    time_emb = jax.random.normal(kt, (bs, time_emb_dim), jnp.float32)
    params = make_params(kp, dim_in, dim_out, time_emb_dim)

    out = jax.block_until_ready(
        time_merge(x, time_emb, params,
                   dim_in=dim_in, dim_out=dim_out, time_emb_dim=time_emb_dim))
    ref = time_merge_ref(x, time_emb, params, dim_in=dim_in, dim_out=dim_out)
    assert out.shape == (bs, dim_out, n_stk, n_stk_pnt)
    assert jnp.allclose(out, ref, atol=1e-4, rtol=1e-4), \
        float(jnp.max(jnp.abs(out - ref)))

    # Case 2: dim_in == dim_out (identity residual), 3D input.
    d = 8
    x2 = jax.random.normal(kx2, (bs, d, 384), jnp.float32)
    params2 = make_params(kp2, d, d, time_emb_dim)
    out2 = jax.block_until_ready(
        time_merge(x2, time_emb, params2,
                   dim_in=d, dim_out=d, time_emb_dim=time_emb_dim))
    ref2 = time_merge_ref(x2, time_emb, params2, dim_in=d, dim_out=d)
    assert out2.shape == (bs, d, 384)
    assert jnp.allclose(out2, ref2, atol=1e-4, rtol=1e-4), \
        float(jnp.max(jnp.abs(out2 - ref2)))

    print("KERNEL_OK")
</pallas_src>

<mosaic_0001>
module attributes {stable_mosaic.version = 11 : i64} {
  func.func @time_merge_kernel(%arg0: i32, %arg1: i32, %arg2: memref<1x4x256xf32, #tpu.memory_space<vmem>>, %arg3: memref<1x8x1xf32, #tpu.memory_space<vmem>>, %arg4: memref<1x8x1xf32, #tpu.memory_space<vmem>>, %arg5: memref<8x4xbf16, #tpu.memory_space<vmem>>, %arg6: memref<8x1xf32, #tpu.memory_space<vmem>>, %arg7: memref<8x1xf32, #tpu.memory_space<vmem>>, %arg8: memref<8x8xbf16, #tpu.memory_space<vmem>>, %arg9: memref<8x1xf32, #tpu.memory_space<vmem>>, %arg10: memref<8x1xf32, #tpu.memory_space<vmem>>, %arg11: memref<8x4xbf16, #tpu.memory_space<vmem>>, %arg12: memref<8x1xf32, #tpu.memory_space<vmem>>, %arg13: memref<1x8x256xf32, #tpu.memory_space<vmem>>) attributes {dimension_semantics = [#tpu.dimension_semantics<parallel>, #tpu.dimension_semantics<parallel>], iteration_bounds = array<i64: 2, 1>, scalar_prefetch = 0 : i64, scratch_operands = 0 : i64, tpu.core_type = #tpu.core_type<tc>, window_params = [{transform_indices = @transform_0, window_bounds = array<i64: 1, 4, 256>}, {transform_indices = @transform_1, window_bounds = array<i64: 1, 8, 1>}, {transform_indices = @transform_2, window_bounds = array<i64: 1, 8, 1>}, {pipeline_mode = #tpu.pipeline_mode<synchronous>, transform_indices = @transform_3, window_bounds = array<i64: 8, 4>}, {pipeline_mode = #tpu.pipeline_mode<synchronous>, transform_indices = @transform_4, window_bounds = array<i64: 8, 1>}, {pipeline_mode = #tpu.pipeline_mode<synchronous>, transform_indices = @transform_5, window_bounds = array<i64: 8, 1>}, {pipeline_mode = #tpu.pipeline_mode<synchronous>, transform_indices = @transform_6, window_bounds = array<i64: 8, 8>}, {pipeline_mode = #tpu.pipeline_mode<synchronous>, transform_indices = @transform_7, window_bounds = array<i64: 8, 1>}, {pipeline_mode = #tpu.pipeline_mode<synchronous>, transform_indices = @transform_8, window_bounds = array<i64: 8, 1>}, {pipeline_mode = #tpu.pipeline_mode<synchronous>, transform_indices = @transform_9, window_bounds = array<i64: 8, 4>}, {pipeline_mode = #tpu.pipeline_mode<synchronous>, transform_indices = @transform_10, window_bounds = array<i64: 8, 1>}, {transform_indices = @transform_11, window_bounds = array<i64: 1, 8, 256>}]} {
    %c0 = arith.constant 0 : index
    %c0_0 = arith.constant 0 : index
    %c0_1 = arith.constant 0 : index
    %0 = vector.load %arg2[%c0, %c0_0, %c0_1] : memref<1x4x256xf32, #tpu.memory_space<vmem>>, vector<1x4x256xf32>
    %1 = vector.shape_cast %0 : vector<1x4x256xf32> to vector<4x256xf32>
    %2 = arith.truncf %1 : vector<4x256xf32> to vector<4x256xbf16>
    %c0_2 = arith.constant 0 : index
    %c0_3 = arith.constant 0 : index
    %c0_4 = arith.constant 0 : index
    %3 = vector.load %arg3[%c0_2, %c0_3, %c0_4] : memref<1x8x1xf32, #tpu.memory_space<vmem>>, vector<1x8x1xf32>
    %4 = vector.shape_cast %3 : vector<1x8x1xf32> to vector<8x1xf32>
    %c0_5 = arith.constant 0 : index
    %c0_6 = arith.constant 0 : index
    %c0_7 = arith.constant 0 : index
    %5 = vector.load %arg4[%c0_5, %c0_6, %c0_7] : memref<1x8x1xf32, #tpu.memory_space<vmem>>, vector<1x8x1xf32>
    %6 = vector.shape_cast %5 : vector<1x8x1xf32> to vector<8x1xf32>
    %c0_8 = arith.constant 0 : index
    %c0_9 = arith.constant 0 : index
    %7 = vector.load %arg5[%c0_8, %c0_9] : memref<8x4xbf16, #tpu.memory_space<vmem>>, vector<8x4xbf16>
    %cst = arith.constant dense<0.000000e+00> : vector<8x256xf32>
    %8 = tpu.matmul %7, %2, %cst {dimension_numbers = #tpu.dot_dimension_numbers<[1], [0], [0], [1], [0, 0, 1, 1], [], []>} : vector<8x4xbf16>, vector<4x256xbf16>, vector<8x256xf32> -> vector<8x256xf32>
    %c0_10 = arith.constant 0 : index
    %c0_11 = arith.constant 0 : index
    %9 = vector.load %arg6[%c0_10, %c0_11] : memref<8x1xf32, #tpu.memory_space<vmem>>, vector<8x1xf32>
    %10 = vector.broadcast %9 : vector<8x1xf32> to vector<8x256xf32>
    %11 = arith.addf %8, %10 : vector<8x256xf32>
    %12 = arith.mulf %11, %11 : vector<8x256xf32>
    %cst_12 = arith.constant dense<0.000000e+00> : vector<256xf32>
    %13 = vector.multi_reduction <add>, %12, %cst_12 [0] : vector<8x256xf32> to vector<256xf32>
    %14 = vector.shape_cast %13 : vector<256xf32> to vector<1x256xf32>
    %cst_13 = arith.constant 1.000000e-24 : f32
    %15 = vector.broadcast %cst_13 : f32 to vector<1x256xf32>
    %16 = arith.maximumf %14, %15 : vector<1x256xf32>
    %17 = math.rsqrt %16 : vector<1x256xf32>
    %18 = vector.broadcast %17 : vector<1x256xf32> to vector<8x256xf32>
    %19 = arith.mulf %11, %18 : vector<8x256xf32>
    %c0_14 = arith.constant 0 : index
    %c0_15 = arith.constant 0 : index
    %20 = vector.load %arg7[%c0_14, %c0_15] : memref<8x1xf32, #tpu.memory_space<vmem>>, vector<8x1xf32>
    %cst_16 = arith.constant 2.82842708 : f32
    %21 = vector.broadcast %cst_16 : f32 to vector<8x1xf32>
    %22 = arith.mulf %20, %21 : vector<8x1xf32>
    %23 = vector.broadcast %22 : vector<8x1xf32> to vector<8x256xf32>
    %24 = arith.mulf %19, %23 : vector<8x256xf32>
    %cst_17 = arith.constant 1.000000e+00 : f32
    %25 = vector.broadcast %cst_17 : f32 to vector<8x1xf32>
    %26 = arith.addf %4, %25 : vector<8x1xf32>
    %27 = vector.broadcast %26 : vector<8x1xf32> to vector<8x256xf32>
    %28 = arith.mulf %24, %27 : vector<8x256xf32>
    %29 = vector.broadcast %6 : vector<8x1xf32> to vector<8x256xf32>
    %30 = arith.addf %28, %29 : vector<8x256xf32>
    %31 = arith.negf %30 : vector<8x256xf32>
    %32 = math.exp %31 : vector<8x256xf32>
    %cst_18 = arith.constant 1.000000e+00 : f32
    %33 = vector.broadcast %cst_18 : f32 to vector<8x256xf32>
    %34 = arith.addf %33, %32 : vector<8x256xf32>
    %35 = arith.divf %33, %34 : vector<8x256xf32>
    %36 = arith.mulf %30, %35 : vector<8x256xf32>
    %c0_19 = arith.constant 0 : index
    %c0_20 = arith.constant 0 : index
    %37 = vector.load %arg8[%c0_19, %c0_20] : memref<8x8xbf16, #tpu.memory_space<vmem>>, vector<8x8xbf16>
    %38 = arith.truncf %36 : vector<8x256xf32> to vector<8x256xbf16>
    %cst_21 = arith.constant dense<0.000000e+00> : vector<8x256xf32>
    %39 = tpu.matmul %37, %38, %cst_21 {dimension_numbers = #tpu.dot_dimension_numbers<[1], [0], [0], [1], [0, 0, 1, 1], [], []>} : vector<8x8xbf16>, vector<8x256xbf16>, vector<8x256xf32> -> vector<8x256xf32>
    %c0_22 = arith.constant 0 : index
    %c0_23 = arith.constant 0 : index
    %40 = vector.load %arg9[%c0_22, %c0_23] : memref<8x1xf32, #tpu.memory_space<vmem>>, vector<8x1xf32>
    %41 = vector.broadcast %40 : vector<8x1xf32> to vector<8x256xf32>
    %42 = arith.addf %39, %41 : vector<8x256xf32>
    %43 = arith.mulf %42, %42 : vector<8x256xf32>
    %cst_24 = arith.constant dense<0.000000e+00> : vector<256xf32>
    %44 = vector.multi_reduction <add>, %43, %cst_24 [0] : vector<8x256xf32> to vector<256xf32>
    %45 = vector.shape_cast %44 : vector<256xf32> to vector<1x256xf32>
    %cst_25 = arith.constant 1.000000e-24 : f32
    %46 = vector.broadcast %cst_25 : f32 to vector<1x256xf32>
    %47 = arith.maximumf %45, %46 : vector<1x256xf32>
    %48 = math.rsqrt %47 : vector<1x256xf32>
    %49 = vector.broadcast %48 : vector<1x256xf32> to vector<8x256xf32>
    %50 = arith.mulf %42, %49 : vector<8x256xf32>
    %c0_26 = arith.constant 0 : index
    %c0_27 = arith.constant 0 : index
    %51 = vector.load %arg10[%c0_26, %c0_27] : memref<8x1xf32, #tpu.memory_space<vmem>>, vector<8x1xf32>
    %cst_28 = arith.constant 2.82842708 : f32
    %52 = vector.broadcast %cst_28 : f32 to vector<8x1xf32>
    %53 = arith.mulf %51, %52 : vector<8x1xf32>
    %54 = vector.broadcast %53 : vector<8x1xf32> to vector<8x256xf32>
    %55 = arith.mulf %50, %54 : vector<8x256xf32>
    %56 = arith.negf %55 : vector<8x256xf32>
    %57 = math.exp %56 : vector<8x256xf32>
    %cst_29 = arith.constant 1.000000e+00 : f32
    %58 = vector.broadcast %cst_29 : f32 to vector<8x256xf32>
    %59 = arith.addf %58, %57 : vector<8x256xf32>
    %60 = arith.divf %58, %59 : vector<8x256xf32>
    %61 = arith.mulf %55, %60 : vector<8x256xf32>
    %c0_30 = arith.constant 0 : index
    %c0_31 = arith.constant 0 : index
    %62 = vector.load %arg11[%c0_30, %c0_31] : memref<8x4xbf16, #tpu.memory_space<vmem>>, vector<8x4xbf16>
    %cst_32 = arith.constant dense<0.000000e+00> : vector<8x256xf32>
    %63 = tpu.matmul %62, %2, %cst_32 {dimension_numbers = #tpu.dot_dimension_numbers<[1], [0], [0], [1], [0, 0, 1, 1], [], []>} : vector<8x4xbf16>, vector<4x256xbf16>, vector<8x256xf32> -> vector<8x256xf32>
    %c0_33 = arith.constant 0 : index
    %c0_34 = arith.constant 0 : index
    %64 = vector.load %arg12[%c0_33, %c0_34] : memref<8x1xf32, #tpu.memory_space<vmem>>, vector<8x1xf32>
    %65 = vector.broadcast %64 : vector<8x1xf32> to vector<8x256xf32>
    %66 = arith.addf %63, %65 : vector<8x256xf32>
    %67 = arith.addf %61, %66 : vector<8x256xf32>
    %c0_35 = arith.constant 0 : index
    %c0_36 = arith.constant 0 : index
    %c0_37 = arith.constant 0 : index
    %68 = vector.load %arg13[%c0_35, %c0_36, %c0_37] : memref<1x8x256xf32, #tpu.memory_space<vmem>>, vector<1x8x256xf32>
    %69 = vector.shape_cast %68 : vector<1x8x256xf32> to vector<8x256xf32>
    %70 = vector.shape_cast %67 : vector<8x256xf32> to vector<1x8x256xf32>
    tpu.vector_store %arg13[%c0_35, %c0_36, %c0_37], %70 {strides = array<i32>} : memref<1x8x256xf32, #tpu.memory_space<vmem>>, vector<1x8x256xf32>,
    return
  }
  func.func @transform_0(%arg0: i32, %arg1: i32) -> (i32, i32, i32) {
    %c0_i32 = arith.constant 0 : i32
    %c0_i32_0 = arith.constant 0 : i32
    return %arg0, %c0_i32, %arg1 : i32, i32, i32
  }
  func.func @transform_1(%arg0: i32, %arg1: i32) -> (i32, i32, i32) {
    %c0_i32 = arith.constant 0 : i32
    %c0_i32_0 = arith.constant 0 : i32
    %c0_i32_1 = arith.constant 0 : i32
    return %arg0, %c0_i32, %c0_i32_0 : i32, i32, i32
  }
  func.func @transform_2(%arg0: i32, %arg1: i32) -> (i32, i32, i32) {
    %c0_i32 = arith.constant 0 : i32
    %c0_i32_0 = arith.constant 0 : i32
    %c0_i32_1 = arith.constant 0 : i32
    return %arg0, %c0_i32, %c0_i32_0 : i32, i32, i32
  }
  func.func @transform_3(%arg0: i32, %arg1: i32) -> (i32, i32) {
    %c0_i32 = arith.constant 0 : i32
    %c0_i32_0 = arith.constant 0 : i32
    %c0_i32_1 = arith.constant 0 : i32
    return %c0_i32, %c0_i32_0 : i32, i32
  }
  func.func @transform_4(%arg0: i32, %arg1: i32) -> (i32, i32) {
    %c0_i32 = arith.constant 0 : i32
    %c0_i32_0 = arith.constant 0 : i32
    %c0_i32_1 = arith.constant 0 : i32
    return %c0_i32, %c0_i32_0 : i32, i32
  }
  func.func @transform_5(%arg0: i32, %arg1: i32) -> (i32, i32) {
    %c0_i32 = arith.constant 0 : i32
    %c0_i32_0 = arith.constant 0 : i32
    %c0_i32_1 = arith.constant 0 : i32
    return %c0_i32, %c0_i32_0 : i32, i32
  }
  func.func @transform_6(%arg0: i32, %arg1: i32) -> (i32, i32) {
    %c0_i32 = arith.constant 0 : i32
    %c0_i32_0 = arith.constant 0 : i32
    %c0_i32_1 = arith.constant 0 : i32
    return %c0_i32, %c0_i32_0 : i32, i32
  }
  func.func @transform_7(%arg0: i32, %arg1: i32) -> (i32, i32) {
    %c0_i32 = arith.constant 0 : i32
    %c0_i32_0 = arith.constant 0 : i32
    %c0_i32_1 = arith.constant 0 : i32
    return %c0_i32, %c0_i32_0 : i32, i32
  }
  func.func @transform_8(%arg0: i32, %arg1: i32) -> (i32, i32) {
    %c0_i32 = arith.constant 0 : i32
    %c0_i32_0 = arith.constant 0 : i32
    %c0_i32_1 = arith.constant 0 : i32
    return %c0_i32, %c0_i32_0 : i32, i32
  }
  func.func @transform_9(%arg0: i32, %arg1: i32) -> (i32, i32) {
    %c0_i32 = arith.constant 0 : i32
    %c0_i32_0 = arith.constant 0 : i32
    %c0_i32_1 = arith.constant 0 : i32
    return %c0_i32, %c0_i32_0 : i32, i32
  }
  func.func @transform_10(%arg0: i32, %arg1: i32) -> (i32, i32) {
    %c0_i32 = arith.constant 0 : i32
    %c0_i32_0 = arith.constant 0 : i32
    %c0_i32_1 = arith.constant 0 : i32
    return %c0_i32, %c0_i32_0 : i32, i32
  }
  func.func @transform_11(%arg0: i32, %arg1: i32) -> (i32, i32, i32) {
    %c0_i32 = arith.constant 0 : i32
    %c0_i32_0 = arith.constant 0 : i32
    return %arg0, %c0_i32, %arg1 : i32, i32, i32
  }
}

</mosaic_0001>

<bundles_post_ra>
// kernel: tpu_custom_call.1
= control target key start
LH: loop header
LB: loop body
LE: loop exit
PB: predicated region body
PF: predicated region fallthrough
CT: control target
= control target key end

     0   :  { %s1288_s0 = inlined_call_operand.vmem [shape: f32[2,4,256], index: 0, kind: input, shape index: {}]   ;;  %s1289_s1 = inlined_call_operand.vmem [shape: f32[2,8,1], index: 1, kind: input, shape index: {}]   ;;  %s1290_s2 = inlined_call_operand.vmem [shape: f32[2,8,1], index: 2, kind: input, shape index: {}]   ;;  %s1291_s3 = inlined_call_operand.vmem [shape: bf16[8,4], index: 3, kind: input, shape index: {}]   ;;  %s1292_s4 = inlined_call_operand.vmem [shape: f32[8,1], index: 4, kind: input, shape index: {}]   ;;  %s1293_s5 = inlined_call_operand.vmem [shape: f32[8,1], index: 5, kind: input, shape index: {}]   ;;  %s1294_s6 = inlined_call_operand.vmem [shape: bf16[8,8], index: 6, kind: input, shape index: {}]   ;;  %s1295_s7 = inlined_call_operand.vmem [shape: f32[8,1], index: 7, kind: input, shape index: {}]   ;;  %s1296_s8 = inlined_call_operand.vmem [shape: f32[8,1], index: 8, kind: input, shape index: {}]   ;;  %s1297_s9 = inlined_call_operand.vmem [shape: bf16[8,4], index: 9, kind: input, shape index: {}]   ;;  %s1298_s10 = inlined_call_operand.vmem [shape: f32[8,1], index: 10, kind: input, shape index: {}]   ;;  %s1299_s11 = inlined_call_operand.hbm [shape: f32[2,8,256], index: 11, kind: output, shape index: {}]  }
   0x1   :  { %1302 = sst [smem:[#allocation7_spill]] %s1292_s4 }
   0x2   :  { %16 = vsyncpa [#allocation3], 0 }
   0x3   :  { %18 = vsyncpa [#allocation3 + $0x1], 0  ;;  %s1151_s17 = smov 0   ;;  %s1153_s18 = smov 0  }
   0x4   :  { %s1155_s19 = smov 0   ;;  %s1157_s20 = smov 0  }
   0x5   :  { %s1159_s21 = smov 0   ;;  %s1161_s22 = smov 0  }
   0x6 LB: > { %1303 = sst [smem:[#allocation5_spill]] %s1084_s21  ;;  %s900_s23 = sadd.s32 4294967295, %s1088_s22   ;;  %s1088_s22 = sphi %s1161_s22, %s24_s22   ;;  %s1084_s21 = sphi %s1159_s21, %s1309_s21   ;;  %s1080_s20 = sphi %s1157_s20, %s1308_s20   ;;  %s1076_s19 = sphi %s1155_s19, %s1312_s19   ;;  %s1072_s18 = sphi %s1153_s18, %s1311_s18   ;;  %s1068_s17 = sphi %s1151_s17, %s1310_s17  }
   0x7   : > { %s901_s24 = sadd.s32 4294967294, %s1088_s22   ;;  %s36_s25 = sadd.s32 1, %s1084_s21 }
   0x8   : > { %s293_s26 = sadd.s32 1, %s1076_s19  ;;  %p38_p0 = scmp.ge.s32.totalorder %s36_s25, 2 }
   0x9   : > { %p303_p1 = scmp.ne.s32.totalorder %s1076_s19, %s1072_s18  ;;  %p304_p2 = scmp.eq.s32.totalorder %s900_s23, 1 }
   0xa   : > { %p309_p3 = scmp.ne.s32.totalorder %s1072_s18, %s1068_s17  ;;  %s1314_s25 = smov (%p38_p0, %s36_s25), 0 }
   0xb   : > { %1304 = sst [smem:[#allocation6_spill]] %s1314_s25  ;;  %p1191_p4 = por %p304_p2, %p303_p1 }
   0xc   : > { %p310_p5 = scmp.eq.s32.totalorder %s901_s24, 1  ;;  %s288_s28 = ssub.s32 %s1084_s21, %s1314_s25 }
   0xd   : > { %p904_p6 = scmp.ge.s32.totalorder %s1088_s22, 1  ;;  %p291_p7 = scmp.eq.s32.totalorder %s288_s28, 0 }
   0xe   : > { %p1198_p8 = por %p310_p5, %p309_p3  ;;  %p379_p9 = scmp.lt.s32.totalorder %s1088_s22, 3 }
   0xf   : > { %s1204_s30 = scalar_select %p291_p7, %s1076_s19, %s293_s26  }
  0x10   : > { %p380_p10 = pnand %p904_p6, %p379_p9 }
  0x11   : > { %s1307_s4 = sld [smem:[#allocation7_spill]] (!%p380_p10)  ;;  %p432_p11 = scmp.lt.s32.totalorder (!%p380_p10), %s1080_s20, 1 }
  0x12   : > { %383 = sbr.rel (%p380_p10) target bundleno = 456 (0x1c8), region = 64 }
  0x17   : > { %v463_v0 = vld [vmem:[%s1307_s4] sm:$0xff]  ;;  %v1090_v1 = vmov 0   ;;  %s433_s14 = scalar_select %p432_p11, %s1080_s20, 1  ;;  %vm473_vm0 = vcmask 1041408   ;;  %vm469_vm1 = vcmask 31744  }
  0x18   : > { %983 = vset.pattern.permute.xlu0 %v1090_v1  ;;  %984 = vset.pattern.permute.xlu1 %v1090_v1  ;;  %v544_v2 = vld [vmem:[%s1293_s5] sm:$0xff] }
  0x19   : > { %466 = vperm.xlu0 %983, %v463_v0   ;;  %985 = vset.pattern.permute.xlu2 %v1090_v1  ;;  %s925_s23 = sshll.u32 %s433_s14, 3  ;;  %v545_v4 = vmul.f32 2.828427, %v544_v2  ;;  %v742_v12 = vld [vmem:[%s1298_s10] sm:$0xff]  ;;  %s428_s14 = sand.u32 1, %s1072_s18  }
  0x1a   : > { %s439_s28 = scalar_lea.vmem %s1288_s0, %s925_s23  ;;  %s444_s4 = scalar_lea.vmem %s1289_s1, %s925_s23  ;;  %v462_v15 = vld [vmem:[%s1291_s3] sm:$0xf] }
  0x1b   : > { %v451_v3 = vld [vmem:[%s439_s28] sm:$0xff]  ;;  %s448_s15 = scalar_lea.vmem %s1290_s2, %s925_s23  ;;  %s905_s16 = sshll.u32 %s428_s14, 4 }
  0x1c   : > { %v460_v5 = vld [vmem:[%s444_s4] sm:$0xff]  ;;  %453 = vst [vmem:[#allocation1] ss:$2 sm:$0xff] %v451_v3  ;;  %s926_s4 = sshll.u32 %s1080_s20, 4  ;;  %s430_s20 = scalar_lea.vmem [#allocation2], %s905_s16 }
  0x1d   : > { %v553_v6 = vadd.f32 1.0, %v460_v5  ;;  %v461_v7 = vld [vmem:[%s448_s15] sm:$0xff]  ;;  %s795_s25 = scalar_lea.hbm %s1299_s11, %s926_s4  ;;  %s797_s23 = sshll.u32 %s430_s20, 4  ;;  %s798_s23 = int_to_ptr.vmem [resolvable:$true] %s797_s23 }
  0x1e   : > { %v741_v16 = vld [vmem:[%s1297_s9] sm:$0xf]  ;;  %s799_s26 = sshll.u32 %s795_s25, 4  ;;  %s782_s28 = scalar_lea.sflag [#allocation3], %s428_s14  ;;  %s800_s26 = int_to_ptr.hbm [resolvable:$true] %s799_s26 }
  0x1f   : > { %556 = vperm.xlu1 %984, %v553_v6   ;;  %s1024_s12 = sshra.s32 %s800_s26, 4  ;;  %s1030_s4 = scalar_lea.hbm %s1299_s11, 32  ;;  %s1025_s12 = int_to_ptr.hbm [resolvable:$true] %s1024_s12 }
  0x20   : > { %s1026_s13 = scalar_lea.hbm %s1025_s12, 16  ;;  %p1031_p1 = scmp.lt.s32.totalorder %s1025_s12, %s1299_s11 }
  0x21   : > { %548 = vperm.xlu0 %983, %v545_v4   ;;  %p1027_p12 = scmp.ne.s32.totalorder %s1025_s12, %s1026_s13  ;;  %p1032_p2 = scmp.lt.s32.totalorder %s1030_s4, %s1026_s13 }
  0x23   : > { %v454_v8 = vld.sshfl [vmem:[#allocation1] sm:$0xff pattern:$0x75316420]  ;;  %v455_v9 = vld.sshfl [vmem:[#allocation1 + $0x8] sm:$0xff pattern:$0x75316420]  ;;  %p1028_p13 = pnand %p1027_p12, %p1191_p4  ;;  %p1033_p3 = por %p1032_p2, %p1031_p1 }
  0x24   : > { %v458_v10 = vpack.c.bf16 %v454_v8, %v454_v8  ;;  %v459_v11 = vpack.c.bf16 %v455_v9, %v455_v9  ;;  %v692_v8 = vld [vmem:[%s1296_s8] sm:$0xff] }
  0x25   : > { %p1029_p0 = pneg %p1028_p13 }
  0x26   : > { %v475_v13 = vsel %vm473_vm0, %v458_v10, 0  ;;  %v478_v14 = vsel %vm473_vm0, %v459_v11, 0  ;;  %vm621_vm0 = vcmask 1043456  }
  0x27   : > { %563 = vperm.xlu1 %984, %v461_v7   ;;  %487 = vmatpush.bf16.msra.mxu0 %v475_v13  ;;  %v611_v7 = vld [vmem:[%s1295_s7] sm:$0xff]  ;;  %p1034_p5 = pnand %p1033_p3, %p1029_p0 }
  0x28   : > { %500 = vmatpush.bf16.msra.mxu1 %v478_v14  ;;  %614 = vperm.xlu2 %985, %v611_v7  }
  0x29   : > { %745 = vperm.xlu0 %983, %v742_v12  }
  0x2a   : > { %910 = vmatmul.msk.bf16.vlgmr.msra.gmra.mxu0 %vm469_vm1, %v462_v15 }
  0x2b   : > { %758 = vmatpush.bf16.msrb.mxu0 %v475_v13  ;;  %911 = vmatmul.msk.bf16.vlgmr.msra.gmra.mxu1 %vm469_vm1, %v462_v15  ;;  %v693_v13 = vmul.f32 2.828427, %v692_v8 }
  0x2c   : > { %771 = vmatpush.bf16.msrb.mxu1 %v478_v14 }
  0x30   : > { %696 = vperm.xlu2 %985, %v693_v13  }
  0x3a   : > { %918 = vmatmul.msk.bf16.vlgmr.msrb.gmra.mxu0 %vm469_vm1, %v741_v16 }
  0x3b   : > { %919 = vmatmul.msk.bf16.vlgmr.msrb.gmra.mxu1 %vm469_vm1, %v741_v16  ;;  %vm617_vm1 = vcmask 64512  }
  0x8b   : > { %v467_v17 = vpop.permute.xlu0 %466 }
  0x91   : > { %v557_v53 = vpop.permute.xlu1 %556 }
  0x93   : > { %v549_v60 = vpop.permute.xlu0 %548 }
  0x99   : > { %v564_v2 = vpop.permute.xlu1 %563 }
  0xa7   : > { %v489_v18 = vpop.f32.mrf.mxu0 }
  0xa8   : > { %v502_v19 = vpop.f32.mrf.mxu1  ;;  %v490_v20 = vadd.f32 %v489_v18, %v467_v17 }
  0xa9   : > { %v503_v21 = vadd.f32 %v502_v19, %v467_v17 }
  0xaa   : > { %v506_v22 = vmul.f32 %v490_v20, %v490_v20 }
  0xab   : > { %v507_v23 = vmul.f32 %v503_v21, %v503_v21 }
  0xac   : > { %v508_v24 = vrot.slane %v506_v22, 4 }
  0xad   : > { %v514_v25 = vrot.slane %v507_v23, 4 }
  0xae   : > { %v509_v26 = vadd.f32 %v508_v24, %v506_v22 }
  0xaf   : > { %v515_v27 = vadd.f32 %v514_v25, %v507_v23  ;;  %v491_v28 = vpop.f32.mrf.mxu0 }
  0xb0   : > { %v504_v29 = vpop.f32.mrf.mxu1  ;;  %v510_v30 = vrot.slane %v509_v26, 2 }
  0xb1   : > { %v516_v31 = vrot.slane %v515_v27, 2 }
  0xb2   : > { %v511_v32 = vadd.f32 %v510_v30, %v509_v26 }
  0xb3   : > { %v517_v33 = vadd.f32 %v516_v31, %v515_v27 }
  0xb4   : > { %v512_v34 = vrot.slane %v511_v32, 1 }
  0xb5   : > { %v518_v35 = vrot.slane %v517_v33, 1 }
  0xb6   : > { %v513_v36 = vadd.f32 %v512_v34, %v511_v32 }
  0xb7   : > { %v519_v37 = vadd.f32 %v518_v35, %v517_v33  ;;  %v1232_v38 = vpop.f32.mrf.mxu0 }
  0xb8   : > { %v1234_v39 = vpop.f32.mrf.mxu1  ;;  %v520_v40 = vmax.f32 %v513_v36, 1e-24 }
  0xb9   : > { %v521_v41 = vmax.f32 %v519_v37, 1e-24 }
  0xba   : > { %986 = vrsqrt.f32 %v520_v40  ;;  %vm528_vm4 = vweird.f32 %v520_v40 }
  0xbb   : > { %988 = vrsqrt.f32 %v521_v41  ;;  %vm538_vm6 = vweird.f32 %v521_v41 }
  0xbf   : > { %v762_v42 = vpop.f32.mrf.mxu0 }
  0xc0   : > { %v775_v43 = vpop.f32.mrf.mxu1  ;;  %v987_v44 = vpop.eup %986  ;;  %v608_v42 = vld [vmem:[%s1294_s6] sm:$0xf] }
  0xc1   : > { %v989_v45 = vpop.eup %988  ;;  %v523_v46 = vmul.f32 %v987_v44, %v520_v40  ;;  %vm529_vm2 = vweird.f32 %v987_v44  ;;  %v615_v43 = vpop.permute.xlu2 %614 }
  0xc2   : > { %v533_v47 = vmul.f32 %v989_v45, %v521_v41  ;;  %vm539_vm3 = vweird.f32 %v989_v45  ;;  %vm530_vm5 = vmor %vm528_vm4, %vm529_vm2 }
  0xc3   : > { %v524_v48 = vmul.f32 %v987_v44, %v523_v46  ;;  %vm540_vm7 = vmor %vm538_vm6, %vm539_vm3 }
  0xc4   : > { %v534_v49 = vmul.f32 %v989_v45, %v533_v47 }
  0xc5   : > { %v525_v50 = vmul.f32 0.5, %v524_v48 }
  0xc6   : > { %v535_v51 = vmul.f32 0.5, %v534_v49 }
  0xc7   : > { %v526_v52 = vsub.f32 1.5, %v525_v50 }
  0xc8   : > { %v536_v54 = vsub.f32 1.5, %v535_v51 }
  0xc9   : > { %v527_v55 = vmul.f32 %v987_v44, %v526_v52 }
  0xca   : > { %v537_v56 = vmul.f32 %v989_v45, %v536_v54 }
  0xcb   : > { %v531_v57 = vsel %vm530_vm5, %v987_v44, %v527_v55 }
  0xcc   : > { %v542_v58 = vmul.f32 %v531_v57, %v490_v20  ;;  %v541_v59 = vsel %vm540_vm7, %v989_v45, %v537_v56 }
  0xcd   : > { %v543_v61 = vmul.f32 %v541_v59, %v503_v21 }
  0xce   : > { %v551_v62 = vmul.f32 %v549_v60, %v542_v58 }
  0xcf   : > { %v552_v63 = vmul.f32 %v549_v60, %v543_v61 }
  0xd0   : > { %v559_v0 = vmul.f32 %v557_v53, %v551_v62 }
  0xd1   : > { %v560_v1 = vmul.f32 %v557_v53, %v552_v63 }
  0xd2   : > { %v566_v3 = vadd.f32 %v564_v2, %v559_v0 }
  0xd3   : > { %v567_v4 = vadd.f32 %v564_v2, %v560_v1 }
  0xd4   : > { %v912_v5 = vmul.f32 -1.442695, %v566_v3 }
  0xd5   : > { %v913_v6 = vmul.f32 -1.442695, %v567_v4 }
  0xd6   : > { %990 = vpow2.f32 %v912_v5 }
  0xd7   : > { %992 = vpow2.f32 %v913_v6 }
  0xdc   : > { %v991_v9 = vpop.eup %990 }
  0xdd   : > { %v993_v10 = vpop.eup %992  ;;  %v574_v11 = vadd.f32 1.0, %v991_v9 }
  0xde   : > { %v575_v12 = vadd.f32 1.0, %v993_v10 }
  0xdf   : > { %994 = vrcp.f32 %v574_v11  ;;  %v587_v19 = vand.u32 2147483648, %v574_v11  ;;  %v585_v22 = vand.u32 2147483647, %v574_v11  ;;  %vm581_vm10 = vweird.f32 %v574_v11 }
  0xe0   : > { %996 = vrcp.f32 %v575_v12  ;;  %v602_v23 = vand.u32 2147483648, %v575_v12  ;;  %v600_v25 = vand.u32 2147483647, %v575_v12  ;;  %vm596_vm12 = vweird.f32 %v575_v12 }
  0xe1   : > { %v588_v27 = vor.u32 1.1754944e-38, %v587_v19  ;;  %vm586_vm13 = vcmp.eq.f32.partialorder %v585_v22, 8.507059e+37 }
  0xe2   : > { %v603_v30 = vor.u32 1.1754944e-38, %v602_v23  ;;  %vm601_vm15 = vcmp.eq.f32.partialorder %v600_v25, 8.507059e+37 }
  0xe5   : > { %v995_v14 = vpop.eup %994 }
  0xe6   : > { %v997_v15 = vpop.eup %996  ;;  %v577_v16 = vmul.f32 %v995_v14, %v574_v11  ;;  %vm582_vm8 = vweird.f32 %v995_v14 }
  0xe7   : > { %v592_v17 = vmul.f32 %v997_v15, %v575_v12  ;;  %vm597_vm9 = vweird.f32 %v997_v15  ;;  %vm583_vm11 = vmor %vm581_vm10, %vm582_vm8 }
  0xe8   : > { %v578_v18 = vsub.f32 1.0, %v577_v16  ;;  %vm598_vm14 = vmor %vm596_vm12, %vm597_vm9 }
  0xe9   : > { %v593_v20 = vsub.f32 1.0, %v592_v17  ;;  %v697_v17 = vpop.permute.xlu2 %696 }
  0xea   : > { %v579_v21 = vmul.f32 %v995_v14, %v578_v18 }
  0xeb   : > { %v594_v24 = vmul.f32 %v997_v15, %v593_v20 }
  0xec   : > { %v580_v26 = vadd.f32 %v995_v14, %v579_v21 }
  0xed   : > { %v595_v28 = vadd.f32 %v997_v15, %v594_v24 }
  0xee   : > { %v584_v29 = vsel %vm583_vm11, %v995_v14, %v580_v26 }
  0xef   : > { %v589_v31 = vsel %vm586_vm13, %v588_v27, %v584_v29  ;;  %v599_v32 = vsel %vm598_vm14, %v997_v15, %v595_v28 }
  0xf0   : > { %v606_v33 = vmul.f32 %v589_v31, %v566_v3  ;;  %v604_v34 = vsel %vm601_vm15, %v603_v30, %v599_v32 }
  0xf1   : > { %v607_v35 = vmul.f32 %v604_v34, %v567_v4 }
  0xf2   : > { %v609_v36 = vpack.c.bf16 %v606_v33, %v606_v33 }
  0xf3   : > { %v610_v37 = vpack.c.bf16 %v607_v35, %v607_v35 }
  0xf4   : > { %v623_v40 = vsel %vm621_vm0, %v609_v36, 0 }
  0xf5   : > { %635 = vmatpush.bf16.msra.mxu2 %v623_v40  ;;  %v626_v41 = vsel %vm621_vm0, %v610_v37, 0 }
  0xf6   : > { %648 = vmatpush.bf16.msra.mxu3 %v626_v41 }
  0xf8   : > { %914 = vmatmul.msk.bf16.vlgmr.msra.gmra.mxu2 %vm617_vm1, %v608_v42 }
  0xf9   : > { %915 = vmatmul.msk.bf16.vlgmr.msra.gmra.mxu3 %vm617_vm1, %v608_v42 }
 0x17b   : > { %v637_v44 = vpop.f32.mrf.mxu2 }
 0x17c   : > { %v638_v45 = vadd.f32 %v637_v44, %v615_v43  ;;  %v650_v46 = vpop.f32.mrf.mxu3 }
 0x17d   : > { %v651_v47 = vadd.f32 %v650_v46, %v615_v43  ;;  %v746_v46 = vpop.permute.xlu0 %745 }
 0x17e   : > { %v654_v48 = vmul.f32 %v638_v45, %v638_v45 }
 0x17f   : > { %v655_v49 = vmul.f32 %v651_v47, %v651_v47 }
 0x180   : > { %v656_v50 = vrot.slane %v654_v48, 4 }
 0x181   : > { %v662_v51 = vrot.slane %v655_v49, 4 }
 0x182   : > { %v657_v52 = vadd.f32 %v656_v50, %v654_v48 }
 0x183   : > { %v663_v53 = vadd.f32 %v662_v51, %v655_v49  ;;  %v639_v54 = vpop.f32.mrf.mxu2  ;;  %v761_v49 = vadd.f32 %v1232_v38, %v746_v46 }
 0x184   : > { %v658_v55 = vrot.slane %v657_v52, 2  ;;  %v652_v56 = vpop.f32.mrf.mxu3 }
 0x185   : > { %v664_v57 = vrot.slane %v663_v53, 2 }
 0x186   : > { %v659_v58 = vadd.f32 %v658_v55, %v657_v52  ;;  %v774_v52 = vadd.f32 %v1234_v39, %v746_v46 }
 0x187   : > { %v665_v59 = vadd.f32 %v664_v57, %v663_v53 }
 0x188   : > { %v660_v60 = vrot.slane %v659_v58, 1 }
 0x189   : > { %v666_v61 = vrot.slane %v665_v59, 1 }
 0x18a   : > { %v661_v62 = vadd.f32 %v660_v60, %v659_v58 }
 0x18b   : > { %v667_v63 = vadd.f32 %v666_v61, %v665_v59 }
 0x18c   : > { %v668_v0 = vmax.f32 %v661_v62, 1e-24 }
 0x18d   : > { %v669_v1 = vmax.f32 %v667_v63, 1e-24 }
 0x18e   : > { %998 = vrsqrt.f32 %v668_v0  ;;  %vm676_vm4 = vweird.f32 %v668_v0 }
 0x18f   : > { %1000 = vrsqrt.f32 %v669_v1  ;;  %vm686_vm6 = vweird.f32 %v669_v1 }
 0x194   : > { %v999_v2 = vpop.eup %998 }
 0x195   : > { %v1001_v3 = vpop.eup %1000  ;;  %v671_v4 = vmul.f32 %v999_v2, %v668_v0  ;;  %vm677_vm2 = vweird.f32 %v999_v2 }
 0x196   : > { %v681_v5 = vmul.f32 %v1001_v3, %v669_v1  ;;  %vm687_vm3 = vweird.f32 %v1001_v3  ;;  %vm678_vm5 = vmor %vm676_vm4, %vm677_vm2 }
 0x197   : > { %v672_v6 = vmul.f32 %v999_v2, %v671_v4  ;;  %vm688_vm7 = vmor %vm686_vm6, %vm687_vm3 }
 0x198   : > { %v682_v7 = vmul.f32 %v1001_v3, %v681_v5 }
 0x199   : > { %v673_v8 = vmul.f32 0.5, %v672_v6 }
 0x19a   : > { %v683_v9 = vmul.f32 0.5, %v682_v7 }
 0x19b   : > { %v674_v10 = vsub.f32 1.5, %v673_v8 }
 0x19c   : > { %v684_v11 = vsub.f32 1.5, %v683_v9 }
 0x19d   : > { %v675_v12 = vmul.f32 %v999_v2, %v674_v10 }
 0x19e   : > { %v685_v13 = vmul.f32 %v1001_v3, %v684_v11 }
 0x19f   : > { %v679_v14 = vsel %vm678_vm5, %v999_v2, %v675_v12 }
 0x1a0   : > { %v690_v15 = vmul.f32 %v679_v14, %v638_v45  ;;  %v689_v16 = vsel %vm688_vm7, %v1001_v3, %v685_v13 }
 0x1a1   : > { %v691_v18 = vmul.f32 %v689_v16, %v651_v47 }
 0x1a2   : > { %v699_v19 = vmul.f32 %v697_v17, %v690_v15 }
 0x1a3   : > { %v700_v20 = vmul.f32 %v697_v17, %v691_v18 }
 0x1a4   : > { %v916_v21 = vmul.f32 -1.442695, %v699_v19 }
 0x1a5   : > { %v917_v22 = vmul.f32 -1.442695, %v700_v20 }
 0x1a6   : > { %1002 = vpow2.f32 %v916_v21 }
 0x1a7   : > { %1004 = vpow2.f32 %v917_v22 }
 0x1ac   : > { %v1003_v23 = vpop.eup %1002 }
 0x1ad   : > { %v1005_v24 = vpop.eup %1004  ;;  %v707_v25 = vadd.f32 1.0, %v1003_v23 }
 0x1ae   : > { %v708_v26 = vadd.f32 1.0, %v1005_v24 }
 0x1af   : > { %1006 = vrcp.f32 %v707_v25  ;;  %v720_v32 = vand.u32 2147483648, %v707_v25  ;;  %v718_v35 = vand.u32 2147483647, %v707_v25  ;;  %vm714_vm10 = vweird.f32 %v707_v25 }
 0x1b0   : > { %1008 = vrcp.f32 %v708_v26  ;;  %v735_v36 = vand.u32 2147483648, %v708_v26  ;;  %v733_v40 = vand.u32 2147483647, %v708_v26  ;;  %vm729_vm12 = vweird.f32 %v708_v26 }
 0x1b1   : > { %v721_v42 = vor.u32 1.1754944e-38, %v720_v32  ;;  %vm719_vm13 = vcmp.eq.f32.partialorder %v718_v35, 8.507059e+37 }
 0x1b2   : > { %v736_v45 = vor.u32 1.1754944e-38, %v735_v36  ;;  %vm734_vm15 = vcmp.eq.f32.partialorder %v733_v40, 8.507059e+37 }
 0x1b5   : > { %v1007_v27 = vpop.eup %1006 }
 0x1b6   : > { %v1009_v28 = vpop.eup %1008  ;;  %v710_v29 = vmul.f32 %v1007_v27, %v707_v25  ;;  %vm715_vm8 = vweird.f32 %v1007_v27 }
 0x1b7   : > { %v725_v30 = vmul.f32 %v1009_v28, %v708_v26  ;;  %vm730_vm9 = vweird.f32 %v1009_v28  ;;  %vm716_vm11 = vmor %vm714_vm10, %vm715_vm8 }
 0x1b8   : > { %v711_v31 = vsub.f32 1.0, %v710_v29  ;;  %vm731_vm14 = vmor %vm729_vm12, %vm730_vm9 }
 0x1b9   : > { %v726_v33 = vsub.f32 1.0, %v725_v30 }
 0x1ba   : > { %v712_v34 = vmul.f32 %v1007_v27, %v711_v31 }
 0x1bb   : > { %v727_v37 = vmul.f32 %v1009_v28, %v726_v33 }
 0x1bc   : > { %v713_v41 = vadd.f32 %v1007_v27, %v712_v34 }
 0x1bd   : > { %v728_v43 = vadd.f32 %v1009_v28, %v727_v37 }
 0x1be   : > { %v717_v44 = vsel %vm716_vm11, %v1007_v27, %v713_v41 }
 0x1bf   : > { %v722_v47 = vsel %vm719_vm13, %v721_v42, %v717_v44  ;;  %v732_v48 = vsel %vm731_vm14, %v1009_v28, %v728_v43 }
 0x1c0   : > { %v739_v50 = vmul.f32 %v722_v47, %v699_v19  ;;  %v737_v51 = vsel %vm734_vm15, %v736_v45, %v732_v48 }
 0x1c1   : > { %v740_v53 = vmul.f32 %v737_v51, %v700_v20 }
 0x1c2   : > { %v777_v54 = vadd.f32 %v761_v49, %v739_v50 }
 0x1c3   : > { %v778_v55 = vadd.f32 %v774_v52, %v740_v53 }
 0x1c4   : > { %779 = vst [vmem:[%s430_s20] sm:$0xff] %v777_v54 }
 0x1c5   : > { %780 = vst [vmem:[%s430_s20 + $0x8] sm:$0xff] %v778_v55 }
 0x1c6   : > { %1037 = shalt.err (!%p1034_p5)
}
 0x1c7   : > { %927 = dma.vmem_to_hbm [thread:$0]  (%p1191_p4), %s798_s23, 256, %s800_s26, %s782_s28  }
 0x1c8 PF: > { %p933_p6 = scmp.ge.s32.totalorder %s1088_s22, 2  ;;  %s811_s14 = sand.u32 1, %s1068_s17  }
 0x1c9   : > { %s812_s25 = scalar_lea.sflag [#allocation3], %s811_s14 }
 0x1ca   : > { %p930_p7 = pnand %p933_p6, %p1198_p8 }
 0x1cc   : > { %p931_p9 = pneg %p930_p7 }
 0x1ce   : > { %1063 = dma.done.wait (%p931_p9), %s812_s25, 256  }
 0x1cf   : > { %1065 = vsyncadd (%p931_p9), %s812_s25, 4294967040  ;;  %s24_s22 = sadd.s32 1, %s1088_s22   ;;  %s1308_s20 = sld [smem:[#allocation5_spill]] }
 0x1d0   : > { %p21_p10 = scmp.ge.s32.totalorder %s24_s22, 4   ;;  %s1309_s21 = sld [smem:[#allocation6_spill]] }
 0x1d1   : > { %s1310_s17 = smov %s1072_s18  ;;  %s1311_s18 = smov %s1076_s19 }
 0x1d2   : > { %s1312_s19 = smov %s1204_s30  ;;  %23 = sbr.rel (!%p21_p10) target bundleno = 6 (0x6), region = 105 }
 0x1d7   :  { %818 = vsyncpa [#allocation3], 1 }
 0x1d8   :  { %820 = vsyncpa [#allocation3 + $0x1], 1 }

</bundles_post_ra>
